<compile_context>
chip_gen: v6e
topology: v6e:2x2x1
jax: 0.10.0
libtpu: 0.0.40
codegen_flags: <defaults>
</compile_context>

<pallas_src>
import functools
import math

import jax
import jax.numpy as jnp
from jax.experimental import pallas as pl
from jax.experimental.pallas import tpu as pltpu

_LN_EPS = 1e-5


# --------------------------------------------------------------------------
# Hardware probes: generation-aware VMEM budget + optional weight single-buffer.
# --------------------------------------------------------------------------
@functools.lru_cache(maxsize=None)
def _vmem_capacity() -> int:
    try:
        cap = int(pltpu.get_tpu_info().vmem_capacity_bytes)
        if cap > 0:
            return cap
    except Exception:
        pass
    return 64 << 20  # conservative (v7x-sized) fallback


def _probe_kernel(w_ref, o_ref):
    o_ref[...] = w_ref[...] + 1.0


@functools.lru_cache(maxsize=None)
def _single_buffer_ok() -> bool:
    """True if pipeline_mode=pl.Buffered(1) compiles: constant weight blocks are
    then single-buffered (their block index never changes, so double-buffering
    only doubles their VMEM footprint)."""
    try:
        fn = pl.pallas_call(
            _probe_kernel,
            grid=(1,),
            in_specs=[pl.BlockSpec((8, 128), lambda i: (0, 0),
                                   pipeline_mode=pl.Buffered(1))],
            out_specs=pl.BlockSpec((8, 128), lambda i: (0, 0)),
            out_shape=jax.ShapeDtypeStruct((8, 128), jnp.float32),
        )
        jax.block_until_ready(fn(jnp.zeros((8, 128), jnp.float32)))
        return True
    except Exception:
        return False


def _resident_spec(block_shape):
    """Spec for a weight/bias that is fully resident (same block every step)."""
    assert len(block_shape) == 2
    if _single_buffer_ok():
        return pl.BlockSpec(block_shape, lambda b, i: (0, 0),
                            pipeline_mode=pl.Buffered(1))
    return pl.BlockSpec(block_shape, lambda b, i: (0, 0))


def _vmem_limit(stream_bytes, resident_bytes=0, live_bytes=0):
    cap = _vmem_capacity()
    ceiling = (cap * 3) // 4          # headroom for Mosaic internal scratch
    w_mult = 1 if _single_buffer_ok() else 2
    need = 2 * stream_bytes + w_mult * resident_bytes + live_bytes + (4 << 20)
    return int(min(max(need, 32 << 20), ceiling))


def _pick_tile(S, candidates):
    for c in candidates:
        if S % c == 0:
            return c
    return S


def _layernorm(v, g, b):
    mu = jnp.mean(v, axis=-1, keepdims=True)
    var = jnp.mean(jnp.square(v - mu), axis=-1, keepdims=True)  # biased, like torch
    return (v - mu) * jax.lax.rsqrt(var + _LN_EPS) * g + b


# --------------------------------------------------------------------------
# Kernel 1: LayerNorm1 + fused QKV projection (per (batch, S-row-tile) program)
# Outputs stay lane-dense (B, S, D); 1/sqrt(dh) is folded into q here.
# --------------------------------------------------------------------------
def _ln1_qkv_kernel(x_ref, g1_ref, b1_ref, wqkv_ref, bqkv_ref,
                    q_ref, k_ref, v_ref, *, head_dim):
    D = x_ref.shape[2]
    x = x_ref[0]                                             # (tS, D) f32
    h = _layernorm(x, g1_ref[0], b1_ref[0]).astype(jnp.bfloat16)
    qkv = jnp.dot(h, wqkv_ref[...],
                  preferred_element_type=jnp.float32) + bqkv_ref[0]   # (tS, 3D)
    scale = 1.0 / math.sqrt(head_dim)
    q_ref[0] = (qkv[:, 0:D] * scale).astype(q_ref.dtype)
    k_ref[0] = qkv[:, D:2 * D].astype(k_ref.dtype)
    v_ref[0] = qkv[:, 2 * D:3 * D].astype(v_ref.dtype)


# --------------------------------------------------------------------------
# Kernel 2: causal flash attention over the lower-triangular (iq, ik) tile
# pairs only.  Heads are split in-kernel (static lane slices + stack, matmuls
# stay head-batched) and merged back into a lane-dense (tile, D) output slab.
# --------------------------------------------------------------------------
def _flash_attn_kernel(iq_ref, ik_ref, q_ref, k_ref, v_ref, o_ref,
                       m_scr, l_scr, acc_scr, *, n_head, head_dim):
    t = pl.program_id(1)
    iq = iq_ref[t]
    ik = ik_ref[t]
    tq = q_ref.shape[1]
    tk = k_ref.shape[1]

    @pl.when(ik == 0)          # first kv tile of this q-tile group
    def _init():
        m_scr[...] = jnp.full_like(m_scr, -jnp.inf)
        l_scr[...] = jnp.zeros_like(l_scr)
        acc_scr[...] = jnp.zeros_like(acc_scr)

    def split_heads(x2d):      # (tile, D) -> (H, tile, dh), vanilla slice + stack
        return jnp.stack(
            [x2d[:, h * head_dim:(h + 1) * head_dim] for h in range(n_head)],
            axis=0)

    qh = split_heads(q_ref[0])                               # (H, tq, dh) bf16
    kh = split_heads(k_ref[0])
    vh = split_heads(v_ref[0])
    s = jnp.einsum('hqd,hkd->hqk', qh, kh,
                   preferred_element_type=jnp.float32)       # (H, tq, tk) f32

    def update(scores):
        m_prev = m_scr[...]                                   # (H, tq, 1)
        m_new = jnp.maximum(m_prev, jnp.max(scores, axis=-1, keepdims=True))
        alpha = jnp.exp(m_prev - m_new)
        p = jnp.exp(scores - m_new)
        l_scr[...] = alpha * l_scr[...] + jnp.sum(p, axis=-1, keepdims=True)
        acc_scr[...] = alpha * acc_scr[...] + jnp.einsum(
            'hqk,hkd->hqd', p.astype(vh.dtype), vh,
            preferred_element_type=jnp.float32)
        m_scr[...] = m_new

    @pl.when(ik < iq)          # strictly below the diagonal: no mask work at all
    def _off_diag():
        update(s)

    @pl.when(ik == iq)         # diagonal tile: tile-local causal mask + finalize
    def _diag():
        r = jax.lax.broadcasted_iota(jnp.int32, (1, tq, tk), 1)
        c = jax.lax.broadcasted_iota(jnp.int32, (1, tq, tk), 2)
        update(jnp.where(c > r, -jnp.inf, s))                 # diag stays unmasked
        inv_l = pl.reciprocal(l_scr[...], approx=True)        # EUP, nearly free
        out = acc_scr[...] * inv_l                            # (H, tq, dh) f32
        # merge heads into the lane-dense (tq, D) output block (HBM writeback
        # of this block is a full-width, unmasked store).
        for h in range(n_head):
            o_ref[0, :, h * head_dim:(h + 1) * head_dim] = out[h].astype(o_ref.dtype)


# --------------------------------------------------------------------------
# Kernel 3: out-proj + residual + LayerNorm2 + MLP (exact GELU) + residual
# --------------------------------------------------------------------------
def _outproj_mlp_kernel(attn_ref, x_ref, wo_ref, bo_ref, g2_ref, b2_ref,
                        w1_ref, bb1_ref, w2_ref, bb2_ref, o_ref):
    x = x_ref[0]                                              # (tS, D) f32
    y = jnp.dot(attn_ref[0], wo_ref[...],
                preferred_element_type=jnp.float32) + bo_ref[0]
    x1 = y + x                                                # residual 1
    h = _layernorm(x1, g2_ref[0], b2_ref[0]).astype(jnp.bfloat16)
    z = jnp.dot(h, w1_ref[...],
                preferred_element_type=jnp.float32) + bb1_ref[0]
    z = jax.nn.gelu(z, approximate=False)   # exact erf GELU = F.gelu default
    z = jnp.dot(z.astype(jnp.bfloat16), w2_ref[...],
                preferred_element_type=jnp.float32) + bb2_ref[0]
    o_ref[0] = (z + x1).astype(o_ref.dtype)                   # residual 2


# --------------------------------------------------------------------------
# Wrapper
# --------------------------------------------------------------------------
def transformer_block(x, params, *, n_head: int,
                      tile_mlp: int | None = None,
                      tile_attn: int | None = None):
    B, S, D = x.shape
    H = n_head
    assert D % H == 0
    dh = D // H

    # Generation-aware tiling: attention tiles carry quadratic (H, tq, tk) live
    # state, so they are decoupled from (and smaller than) the MLP row tiles.
    big_vmem = _vmem_capacity() >= (96 << 20)     # v5e/v6e 128 MiB vs v7x 64 MiB
    if tile_mlp is None:
        tile_mlp = _pick_tile(S, (1024, 512, 256, 128) if big_vmem
                              else (512, 256, 128))
    if tile_attn is None:
        tile_attn = _pick_tile(S, (512, 256, 128) if big_vmem else (256, 128))
    assert S % tile_mlp == 0 and S % tile_attn == 0
    n_mlp = S // tile_mlp
    n_attn = S // tile_attn

    f32, bf16 = jnp.float32, jnp.bfloat16

    # Cast weights once: halves weight DMA bytes / VMEM and feeds the MXU native
    # bf16 operands (f32 accumulation inside kernels).
    # TODO(synk): for very large D on v7x (64 MiB VMEM), additionally tile
    # wqkv/w1/w2 over their output-column dims (extra grid axis + f32
    # accumulator) so weight tiles stream instead of staying fully resident.
    wqkv = params["wqkv"].astype(bf16)
    wo = params["wo"].astype(bf16)
    w1 = params["w1"].astype(bf16)
    w2 = params["w2"].astype(bf16)
    xf = x.astype(f32)

    row_mlp = pl.BlockSpec((1, tile_mlp, D), lambda b, i: (b, i, 0))

    # ---- kernel 1: LN1 + QKV projection -----------------------------------
    stream1 = tile_mlp * D * 4 + 3 * tile_mlp * D * 2
    resident1 = D * 3 * D * 2 + 3 * D * 4 + 2 * D * 4
    q, k, v = pl.pallas_call(
        functools.partial(_ln1_qkv_kernel, head_dim=dh),
        grid=(B, n_mlp),
        in_specs=[
            row_mlp,
            _resident_spec((1, D)), _resident_spec((1, D)),            # ln1 g, b
            _resident_spec((D, 3 * D)), _resident_spec((1, 3 * D)),    # wqkv, b
        ],
        out_specs=[row_mlp, row_mlp, row_mlp],
        out_shape=[jax.ShapeDtypeStruct((B, S, D), bf16)] * 3,
        compiler_params=pltpu.CompilerParams(
            dimension_semantics=("parallel", "parallel"),
            vmem_limit_bytes=_vmem_limit(stream1, resident1)),
        cost_estimate=pl.CostEstimate(
            flops=2 * B * S * D * 3 * D,
            transcendentals=B * S,
            bytes_accessed=B * S * D * 4 + D * 3 * D * 2 + 3 * B * S * D * 2),
    )(xf, params["ln1_g"].astype(f32), params["ln1_b"].astype(f32),
      wqkv, params["bqkv"].astype(f32))

    # ---- kernel 2: causal flash attention (lower-triangle grid) ------------
    tri = [(i, j) for i in range(n_attn) for j in range(i + 1)]
    n_tri = len(tri)
    iq_tab = jnp.asarray([p[0] for p in tri], jnp.int32)
    ik_tab = jnp.asarray([p[1] for p in tri], jnp.int32)

    q_spec = pl.BlockSpec((1, tile_attn, D), lambda b, t, iq, ik: (b, iq[t], 0))
    kv_spec = pl.BlockSpec((1, tile_attn, D), lambda b, t, iq, ik: (b, ik[t], 0))
    # Output block index depends only on iq[t]; it is constant across the ik
    # steps of a q-tile group, so the single write at ik == iq persists until
    # the block index changes (same invariant the scratch init/finalize use).
    o_spec = pl.BlockSpec((1, tile_attn, D), lambda b, t, iq, ik: (b, iq[t], 0))

    stream2 = 4 * tile_attn * D * 2
    live2 = (2 * H * tile_attn * 128 * 4              # m/l scratch (lane-padded)
             + H * tile_attn * max(dh, 128) * 4       # acc scratch (lane-padded)
             + 2 * H * tile_attn * tile_attn * 4)     # live s/p values
    attn = pl.pallas_call(
        functools.partial(_flash_attn_kernel, n_head=H, head_dim=dh),
        grid_spec=pltpu.PrefetchScalarGridSpec(
            num_scalar_prefetch=2,
            grid=(B, n_tri),
            in_specs=[q_spec, kv_spec, kv_spec],
            out_specs=o_spec,
            scratch_shapes=[
                pltpu.VMEM((H, tile_attn, 1), f32),    # running max m
                pltpu.VMEM((H, tile_attn, 1), f32),    # running denom l
                pltpu.VMEM((H, tile_attn, dh), f32),   # output accumulator
            ]),
        out_shape=jax.ShapeDtypeStruct((B, S, D), bf16),
        compiler_params=pltpu.CompilerParams(
            dimension_semantics=("parallel", "arbitrary"),
            vmem_limit_bytes=_vmem_limit(stream2, 0, live2)),
        cost_estimate=pl.CostEstimate(
            flops=4 * B * n_tri * tile_attn * tile_attn * D,
            transcendentals=B * n_tri * H * tile_attn * tile_attn,
            bytes_accessed=3 * B * n_tri * tile_attn * D * 2 + B * S * D * 2),
    )(iq_tab, ik_tab, q, k, v)

    # ---- kernel 3: out-proj + residual + LN2 + MLP + residual --------------
    stream3 = tile_mlp * D * 2 + 2 * tile_mlp * D * 4
    resident3 = (D * D * 2 + D * 4 + 2 * D * 4
                 + D * 4 * D * 2 + 4 * D * 4 + 4 * D * D * 2 + D * 4)
    live3 = tile_mlp * 4 * D * 4 + 2 * tile_mlp * D * 4
    out = pl.pallas_call(
        _outproj_mlp_kernel,
        grid=(B, n_mlp),
        in_specs=[
            row_mlp, row_mlp,
            _resident_spec((D, D)), _resident_spec((1, D)),            # wo, bo
            _resident_spec((1, D)), _resident_spec((1, D)),            # ln2 g, b
            _resident_spec((D, 4 * D)), _resident_spec((1, 4 * D)),    # w1, b1
            _resident_spec((4 * D, D)), _resident_spec((1, D)),        # w2, b2
        ],
        out_specs=row_mlp,
        out_shape=jax.ShapeDtypeStruct((B, S, D), f32),
        compiler_params=pltpu.CompilerParams(
            dimension_semantics=("parallel", "parallel"),
            vmem_limit_bytes=_vmem_limit(stream3, resident3, live3)),
        cost_estimate=pl.CostEstimate(
            flops=18 * B * S * D * D,
            transcendentals=B * S * 4 * D,
            bytes_accessed=B * S * D * (2 + 4 + 4) + 9 * D * D * 2),
    )(attn, xf, wo, params["bo"].astype(f32),
      params["ln2_g"].astype(f32), params["ln2_b"].astype(f32),
      w1, params["b1"].astype(f32), w2, params["b2"].astype(f32))
    return out


# ---------------------------------------------------------------------------
# Pure-JAX f32 reference (mirrors the PyTorch forward) for a correctness check.
# ---------------------------------------------------------------------------
def reference(x, params, *, n_head: int):
    B, S, D = x.shape
    dh = D // n_head
    eps = 1e-5

    def ln(v, g, b):
        mu = jnp.mean(v, axis=-1, keepdims=True)
        var = jnp.mean((v - mu) ** 2, axis=-1, keepdims=True)
        return (v - mu) / jnp.sqrt(var + eps) * g[0] + b[0]

    residue = x
    h = ln(x, params["ln1_g"], params["ln1_b"])
    qkv = h @ params["wqkv"] + params["bqkv"][0]
    q, k, v = jnp.split(qkv, 3, axis=-1)
    q = q.reshape(B, S, n_head, dh).transpose(0, 2, 1, 3)
    k = k.reshape(B, S, n_head, dh).transpose(0, 2, 1, 3)
    v = v.reshape(B, S, n_head, dh).transpose(0, 2, 1, 3)
    s = jnp.einsum("bhqd,bhkd->bhqk", q, k) / math.sqrt(dh)
    mask = jnp.triu(jnp.ones((S, S), dtype=bool), 1)
    s = jnp.where(mask, -jnp.inf, s)
    p = jax.nn.softmax(s, axis=-1)
    o = jnp.einsum("bhqk,bhkd->bhqd", p, v).transpose(0, 2, 1, 3).reshape(B, S, D)
    o = o @ params["wo"] + params["bo"][0]
    x = o + residue

    residue = x
    h2 = ln(x, params["ln2_g"], params["ln2_b"])
    y = h2 @ params["w1"] + params["b1"][0]
    y = jax.nn.gelu(y, approximate=False)
    y = y @ params["w2"] + params["b2"][0]
    return y + residue


if __name__ == "__main__":
    B, S, D, H = 2, 8, 32, 4  # batch, seq, embed, heads

    key = jax.random.PRNGKey(0)
    keys = jax.random.split(key, 9)

    params = {
        "ln1_g": jnp.ones((1, D), jnp.float32),
        "ln1_b": jnp.zeros((1, D), jnp.float32),
        "wqkv": 0.05 * jax.random.normal(keys[0], (D, 3 * D), jnp.float32),
        "bqkv": 0.01 * jax.random.normal(keys[1], (1, 3 * D), jnp.float32),
        "wo": 0.05 * jax.random.normal(keys[2], (D, D), jnp.float32),
        "bo": 0.01 * jax.random.normal(keys[3], (1, D), jnp.float32),
        "ln2_g": jnp.ones((1, D), jnp.float32),
        "ln2_b": jnp.zeros((1, D), jnp.float32),
        "w1": 0.05 * jax.random.normal(keys[4], (D, 4 * D), jnp.float32),
        "b1": 0.01 * jax.random.normal(keys[5], (1, 4 * D), jnp.float32),
        "w2": 0.05 * jax.random.normal(keys[6], (4 * D, D), jnp.float32),
        "b2": 0.01 * jax.random.normal(keys[7], (1, D), jnp.float32),
    }

    x = jax.random.normal(keys[8], (B, S, D), jnp.float32)

    out = jax.block_until_ready(transformer_block(x, params, n_head=H))
    ref = jax.block_until_ready(reference(x, params, n_head=H))

    assert out.shape == (B, S, D)
    max_err = jnp.max(jnp.abs(out - ref))
    # bf16 MXU operands + approx reciprocal -> loosened tolerance vs f32 reference
    assert jnp.allclose(out, ref, rtol=2e-2, atol=2e-2), f"max abs err {max_err}"
    print("KERNEL_OK")
</pallas_src>

<mosaic_0001>
module attributes {stable_mosaic.version = 11 : i64} {
  func.func @_probe_kernel(%arg0: i32, %arg1: memref<8x128xf32, #tpu.memory_space<vmem>>, %arg2: memref<8x128xf32, #tpu.memory_space<vmem>>) attributes {dimension_semantics = [#tpu.dimension_semantics<arbitrary>], iteration_bounds = array<i64: 1>, scalar_prefetch = 0 : i64, scratch_operands = 0 : i64, tpu.core_type = #tpu.core_type<tc>, window_params = [{pipeline_mode = #tpu.pipeline_mode<synchronous>, transform_indices = @transform_0, window_bounds = array<i64: 8, 128>}, {pipeline_mode = #tpu.pipeline_mode<synchronous>, transform_indices = @transform_1, window_bounds = array<i64: 8, 128>}]} {
    %c0 = arith.constant 0 : index
    %c0_0 = arith.constant 0 : index
    %0 = vector.load %arg1[%c0, %c0_0] : memref<8x128xf32, #tpu.memory_space<vmem>>, vector<8x128xf32>
    %cst = arith.constant 1.000000e+00 : f32
    %1 = vector.broadcast %cst : f32 to vector<8x128xf32>
    %2 = arith.addf %0, %1 : vector<8x128xf32>
    %c0_1 = arith.constant 0 : index
    %c0_2 = arith.constant 0 : index
    %3 = vector.load %arg2[%c0_1, %c0_2] : memref<8x128xf32, #tpu.memory_space<vmem>>, vector<8x128xf32>
    tpu.vector_store %arg2[%c0_1, %c0_2], %2 {strides = array<i32>} : memref<8x128xf32, #tpu.memory_space<vmem>>, vector<8x128xf32>,
    return
  }
  func.func @transform_0(%arg0: i32) -> (i32, i32) {
    %c0_i32 = arith.constant 0 : i32
    %c0_i32_0 = arith.constant 0 : i32
    %c0_i32_1 = arith.constant 0 : i32
    return %c0_i32, %c0_i32_0 : i32, i32
  }
  func.func @transform_1(%arg0: i32) -> (i32, i32) {
    %c0_i32 = arith.constant 0 : i32
    %c0_i32_0 = arith.constant 0 : i32
    %c0_i32_1 = arith.constant 0 : i32
    return %c0_i32, %c0_i32_0 : i32, i32
  }
}

module attributes {stable_mosaic.version = 11 : i64} {
  func.func @_ln1_qkv_kernel(%arg0: i32, %arg1: i32, %arg2: memref<1x8x32xf32, #tpu.memory_space<vmem>>, %arg3: memref<1x32xf32, #tpu.memory_space<vmem>>, %arg4: memref<1x32xf32, #tpu.memory_space<vmem>>, %arg5: memref<32x96xbf16, #tpu.memory_space<vmem>>, %arg6: memref<1x96xf32, #tpu.memory_space<vmem>>, %arg7: memref<1x8x32xbf16, #tpu.memory_space<vmem>>, %arg8: memref<1x8x32xbf16, #tpu.memory_space<vmem>>, %arg9: memref<1x8x32xbf16, #tpu.memory_space<vmem>>) attributes {dimension_semantics = [#tpu.dimension_semantics<parallel>, #tpu.dimension_semantics<parallel>], iteration_bounds = array<i64: 2, 1>, scalar_prefetch = 0 : i64, scratch_operands = 0 : i64, tpu.core_type = #tpu.core_type<tc>, window_params = [{transform_indices = @transform_0, window_bounds = array<i64: 1, 8, 32>}, {pipeline_mode = #tpu.pipeline_mode<synchronous>, transform_indices = @transform_1, window_bounds = array<i64: 1, 32>}, {pipeline_mode = #tpu.pipeline_mode<synchronous>, transform_indices = @transform_2, window_bounds = array<i64: 1, 32>}, {pipeline_mode = #tpu.pipeline_mode<synchronous>, transform_indices = @transform_3, window_bounds = array<i64: 32, 96>}, {pipeline_mode = #tpu.pipeline_mode<synchronous>, transform_indices = @transform_4, window_bounds = array<i64: 1, 96>}, {transform_indices = @transform_5, window_bounds = array<i64: 1, 8, 32>}, {transform_indices = @transform_6, window_bounds = array<i64: 1, 8, 32>}, {transform_indices = @transform_7, window_bounds = array<i64: 1, 8, 32>}]} {
    %c0 = arith.constant 0 : index
    %c0_0 = arith.constant 0 : index
    %c0_1 = arith.constant 0 : index
    %0 = vector.load %arg2[%c0, %c0_0, %c0_1] : memref<1x8x32xf32, #tpu.memory_space<vmem>>, vector<1x8x32xf32>
    %1 = vector.shape_cast %0 : vector<1x8x32xf32> to vector<8x32xf32>
    %c0_2 = arith.constant 0 : index
    %c0_3 = arith.constant 0 : index
    %2 = vector.load %arg3[%c0_2, %c0_3] : memref<1x32xf32, #tpu.memory_space<vmem>>, vector<1x32xf32>
    %3 = vector.shape_cast %2 : vector<1x32xf32> to vector<32xf32>
    %c0_4 = arith.constant 0 : index
    %c0_5 = arith.constant 0 : index
    %4 = vector.load %arg4[%c0_4, %c0_5] : memref<1x32xf32, #tpu.memory_space<vmem>>, vector<1x32xf32>
    %5 = vector.shape_cast %4 : vector<1x32xf32> to vector<32xf32>
    %cst = arith.constant dense<0.000000e+00> : vector<8xf32>
    %6 = vector.multi_reduction <add>, %1, %cst [1] : vector<8x32xf32> to vector<8xf32>
    %7 = vector.shape_cast %6 : vector<8xf32> to vector<8x1xf32>
    %cst_6 = arith.constant 3.200000e+01 : f32
    %8 = vector.broadcast %cst_6 : f32 to vector<8x1xf32>
    %9 = arith.divf %7, %8 : vector<8x1xf32>
    %10 = vector.broadcast %9 : vector<8x1xf32> to vector<8x32xf32>
    %11 = arith.subf %1, %10 : vector<8x32xf32>
    %12 = arith.mulf %11, %11 : vector<8x32xf32>
    %cst_7 = arith.constant dense<0.000000e+00> : vector<8xf32>
    %13 = vector.multi_reduction <add>, %12, %cst_7 [1] : vector<8x32xf32> to vector<8xf32>
    %14 = vector.shape_cast %13 : vector<8xf32> to vector<8x1xf32>
    %cst_8 = arith.constant 3.200000e+01 : f32
    %15 = vector.broadcast %cst_8 : f32 to vector<8x1xf32>
    %16 = arith.divf %14, %15 : vector<8x1xf32>
    %17 = vector.broadcast %9 : vector<8x1xf32> to vector<8x32xf32>
    %18 = arith.subf %1, %17 : vector<8x32xf32>
    %cst_9 = arith.constant 9.99999974E-6 : f32
    %19 = vector.broadcast %cst_9 : f32 to vector<8x1xf32>
    %20 = arith.addf %16, %19 : vector<8x1xf32>
    %21 = math.rsqrt %20 : vector<8x1xf32>
    %22 = vector.broadcast %21 : vector<8x1xf32> to vector<8x32xf32>
    %23 = arith.mulf %18, %22 : vector<8x32xf32>
    %24 = vector.shape_cast %3 : vector<32xf32> to vector<1x32xf32>
    %25 = vector.broadcast %24 : vector<1x32xf32> to vector<8x32xf32>
    %26 = arith.mulf %23, %25 : vector<8x32xf32>
    %27 = vector.shape_cast %5 : vector<32xf32> to vector<1x32xf32>
    %28 = vector.broadcast %27 : vector<1x32xf32> to vector<8x32xf32>
    %29 = arith.addf %26, %28 : vector<8x32xf32>
    %30 = arith.truncf %29 : vector<8x32xf32> to vector<8x32xbf16>
    %c0_10 = arith.constant 0 : index
    %c0_11 = arith.constant 0 : index
    %31 = vector.load %arg5[%c0_10, %c0_11] : memref<32x96xbf16, #tpu.memory_space<vmem>>, vector<32x96xbf16>
    %cst_12 = arith.constant dense<0.000000e+00> : vector<8x96xf32>
    %32 = tpu.matmul %30, %31, %cst_12 {dimension_numbers = #tpu.dot_dimension_numbers<[1], [0], [0], [1], [0, 0, 1, 1], [], []>} : vector<8x32xbf16>, vector<32x96xbf16>, vector<8x96xf32> -> vector<8x96xf32>
    %c0_13 = arith.constant 0 : index
    %c0_14 = arith.constant 0 : index
    %33 = vector.load %arg6[%c0_13, %c0_14] : memref<1x96xf32, #tpu.memory_space<vmem>>, vector<1x96xf32>
    %34 = vector.shape_cast %33 : vector<1x96xf32> to vector<96xf32>
    %35 = vector.shape_cast %34 : vector<96xf32> to vector<1x96xf32>
    %36 = vector.broadcast %35 : vector<1x96xf32> to vector<8x96xf32>
    %37 = arith.addf %32, %36 : vector<8x96xf32>
    %38 = vector.extract_strided_slice %37 {offsets = [0, 0], sizes = [8, 32], strides = [1, 1]} : vector<8x96xf32> to vector<8x32xf32>
    %cst_15 = arith.constant 0.353553385 : f32
    %39 = vector.broadcast %cst_15 : f32 to vector<8x32xf32>
    %40 = arith.mulf %38, %39 : vector<8x32xf32>
    %41 = arith.truncf %40 : vector<8x32xf32> to vector<8x32xbf16>
    %c0_16 = arith.constant 0 : index
    %c0_17 = arith.constant 0 : index
    %c0_18 = arith.constant 0 : index
    %42 = vector.load %arg7[%c0_16, %c0_17, %c0_18] : memref<1x8x32xbf16, #tpu.memory_space<vmem>>, vector<1x8x32xbf16>
    %43 = vector.shape_cast %42 : vector<1x8x32xbf16> to vector<8x32xbf16>
    %44 = vector.shape_cast %41 : vector<8x32xbf16> to vector<1x8x32xbf16>
    tpu.vector_store %arg7[%c0_16, %c0_17, %c0_18], %44 {strides = array<i32>} : memref<1x8x32xbf16, #tpu.memory_space<vmem>>, vector<1x8x32xbf16>,
    %45 = vector.extract_strided_slice %37 {offsets = [0, 32], sizes = [8, 32], strides = [1, 1]} : vector<8x96xf32> to vector<8x32xf32>
    %46 = arith.truncf %45 : vector<8x32xf32> to vector<8x32xbf16>
    %c0_19 = arith.constant 0 : index
    %c0_20 = arith.constant 0 : index
    %c0_21 = arith.constant 0 : index
    %47 = vector.load %arg8[%c0_19, %c0_20, %c0_21] : memref<1x8x32xbf16, #tpu.memory_space<vmem>>, vector<1x8x32xbf16>
    %48 = vector.shape_cast %47 : vector<1x8x32xbf16> to vector<8x32xbf16>
    %49 = vector.shape_cast %46 : vector<8x32xbf16> to vector<1x8x32xbf16>
    tpu.vector_store %arg8[%c0_19, %c0_20, %c0_21], %49 {strides = array<i32>} : memref<1x8x32xbf16, #tpu.memory_space<vmem>>, vector<1x8x32xbf16>,
    %50 = vector.extract_strided_slice %37 {offsets = [0, 64], sizes = [8, 32], strides = [1, 1]} : vector<8x96xf32> to vector<8x32xf32>
    %51 = arith.truncf %50 : vector<8x32xf32> to vector<8x32xbf16>
    %c0_22 = arith.constant 0 : index
    %c0_23 = arith.constant 0 : index
    %c0_24 = arith.constant 0 : index
    %52 = vector.load %arg9[%c0_22, %c0_23, %c0_24] : memref<1x8x32xbf16, #tpu.memory_space<vmem>>, vector<1x8x32xbf16>
    %53 = vector.shape_cast %52 : vector<1x8x32xbf16> to vector<8x32xbf16>
    %54 = vector.shape_cast %51 : vector<8x32xbf16> to vector<1x8x32xbf16>
    tpu.vector_store %arg9[%c0_22, %c0_23, %c0_24], %54 {strides = array<i32>} : memref<1x8x32xbf16, #tpu.memory_space<vmem>>, vector<1x8x32xbf16>,
    return
  }
  func.func @transform_0(%arg0: i32, %arg1: i32) -> (i32, i32, i32) {
    %c0_i32 = arith.constant 0 : i32
    %c0_i32_0 = arith.constant 0 : i32
    return %arg0, %arg1, %c0_i32 : i32, i32, i32
  }
  func.func @transform_1(%arg0: i32, %arg1: i32) -> (i32, i32) {
    %c0_i32 = arith.constant 0 : i32
    %c0_i32_0 = arith.constant 0 : i32
    %c0_i32_1 = arith.constant 0 : i32
    return %c0_i32, %c0_i32_0 : i32, i32
  }
  func.func @transform_2(%arg0: i32, %arg1: i32) -> (i32, i32) {
    %c0_i32 = arith.constant 0 : i32
    %c0_i32_0 = arith.constant 0 : i32
    %c0_i32_1 = arith.constant 0 : i32
    return %c0_i32, %c0_i32_0 : i32, i32
  }
  func.func @transform_3(%arg0: i32, %arg1: i32) -> (i32, i32) {
    %c0_i32 = arith.constant 0 : i32
    %c0_i32_0 = arith.constant 0 : i32
    %c0_i32_1 = arith.constant 0 : i32
    return %c0_i32, %c0_i32_0 : i32, i32
  }
  func.func @transform_4(%arg0: i32, %arg1: i32) -> (i32, i32) {
    %c0_i32 = arith.constant 0 : i32
    %c0_i32_0 = arith.constant 0 : i32
    %c0_i32_1 = arith.constant 0 : i32
    return %c0_i32, %c0_i32_0 : i32, i32
  }
  func.func @transform_5(%arg0: i32, %arg1: i32) -> (i32, i32, i32) {
    %c0_i32 = arith.constant 0 : i32
    %c0_i32_0 = arith.constant 0 : i32
    return %arg0, %arg1, %c0_i32 : i32, i32, i32
  }
  func.func @transform_6(%arg0: i32, %arg1: i32) -> (i32, i32, i32) {
    %c0_i32 = arith.constant 0 : i32
    %c0_i32_0 = arith.constant 0 : i32
    return %arg0, %arg1, %c0_i32 : i32, i32, i32
  }
  func.func @transform_7(%arg0: i32, %arg1: i32) -> (i32, i32, i32) {
    %c0_i32 = arith.constant 0 : i32
    %c0_i32_0 = arith.constant 0 : i32
    return %arg0, %arg1, %c0_i32 : i32, i32, i32
  }
}

</mosaic_0001>

<bundles_post_ra>
// kernel: tpu_custom_call.1
= control target key start
LH: loop header
LB: loop body
LE: loop exit
PB: predicated region body
PF: predicated region fallthrough
CT: control target
= control target key end

     0   :  { %6 = vsyncpa [#allocation3], 0  ;;  %s103_s0 = inlined_call_operand.hbm [shape: f32[8,128], index: 0, kind: input, shape index: {}]   ;;  %s104_s1 = inlined_call_operand.hbm [shape: f32[8,128], index: 1, kind: output, shape index: {}]  }
   0x1   :  { %7 = vsyncpa [#allocation4], 0  ;;  %s85_s6 = smov [#allocation2]  }
   0x2   :  { %s14_s7 = sshll.u32 %s85_s6, 4  ;;  %s15_s7 = int_to_ptr.vmem [resolvable:$true] %s14_s7 }
   0x3   :  { %s49_s8 = scalar_lea.vmem %s15_s7, 128  ;;  %p54_p1 = scmp.lt.s32.totalorder %s15_s7, %s15_s7 }
   0x4   :  { %p50_p0 = scmp.ne.s32.totalorder %s15_s7, %s49_s8  ;;  %p55_p2 = scmp.lt.s32.totalorder %s49_s8, %s49_s8 }
   0x6   :  { %p56_p3 = por %p55_p2, %p54_p1 }
   0x8   :  { %p57_p4 = pnand %p56_p3, %p50_p0 }
   0xa   :  { %60 = shalt.err (!%p57_p4)
}
   0xb   :  { %17 = dma.hbm_to_vmem [thread:$0]  %s103_s0, 128, %s15_s7, [#allocation3]  }
   0xc   :  { %81 = dma.done.wait [#allocation3], 128  }
   0xd   :  { %82 = vsyncadd [#allocation3], 4294967168  ;;  %s86_s11 = smov [#allocation5]   ;;  %v21_v0 = vld [vmem:[#allocation2] sm:$0xff] }
   0xe   :  { %s30_s12 = sshll.u32 %s86_s11, 4  ;;  %v22_v1 = vadd.f32 1.0, %v21_v0  ;;  %s31_s12 = int_to_ptr.vmem [resolvable:$true] %s30_s12 }
   0xf   :  { %s61_s13 = scalar_lea.vmem %s31_s12, 128  ;;  %p66_p6 = scmp.lt.s32.totalorder %s31_s12, %s31_s12 }
  0x10   :  { %23 = vst [vmem:[#allocation5] sm:$0xff] %v22_v1  ;;  %p62_p5 = scmp.ne.s32.totalorder %s31_s12, %s61_s13  ;;  %p67_p7 = scmp.lt.s32.totalorder %s61_s13, %s61_s13 }
  0x12   :  { %p68_p8 = por %p67_p7, %p66_p6 }
  0x14   :  { %p69_p9 = pnand %p68_p8, %p62_p5 }
  0x16   :  { %72 = shalt.err (!%p69_p9)
}
  0x17   :  { %33 = dma.vmem_to_hbm [thread:$0]  %s31_s12, 128, %s104_s1, [#allocation4]  }
  0x18   :  { %83 = dma.done.wait [#allocation4], 128  }
  0x19   :  { %84 = vsyncadd [#allocation4], 4294967168 }
  0x1a   :  { %37 = vsyncpa [#allocation3], 1 }
  0x1b   :  { %38 = vsyncpa [#allocation4], 1 }

// kernel: tpu_custom_call.1
= control target key start
LH: loop header
LB: loop body
LE: loop exit
PB: predicated region body
PF: predicated region fallthrough
CT: control target
= control target key end

     0   :  { %s1300_s0 = inlined_call_operand.hbm [shape: f32[2,8,32], index: 0, kind: input, shape index: {}]   ;;  %s1301_s1 = inlined_call_operand.vmem [shape: f32[1,32], index: 1, kind: input, shape index: {}]   ;;  %s1302_s2 = inlined_call_operand.vmem [shape: f32[1,32], index: 2, kind: input, shape index: {}]   ;;  %s1303_s3 = inlined_call_operand.hbm [shape: bf16[32,96], index: 3, kind: input, shape index: {}]   ;;  %s1304_s4 = inlined_call_operand.vmem [shape: f32[1,96], index: 4, kind: input, shape index: {}]   ;;  %s1305_s5 = inlined_call_operand.hbm [shape: bf16[2,8,32], index: 5, kind: output, shape index: {0}]   ;;  %s1306_s6 = inlined_call_operand.hbm [shape: bf16[2,8,32], index: 6, kind: output, shape index: {1}]   ;;  %s1307_s7 = inlined_call_operand.hbm [shape: bf16[2,8,32], index: 7, kind: output, shape index: {2}]  }
   0x1   :  { %1313 = sst [smem:[#allocation18_spill]] %s1303_s3 }
   0x2   :  { %13 = vsyncpa [#allocation3], 0 }
   0x3   :  { %15 = vsyncpa [#allocation3 + $0x1], 0 }
   0x4   :  { %16 = vsyncpa [#allocation6], 0 }
   0x5   :  { %17 = vsyncpa [#allocation4], 0 }
   0x6   :  { %19 = vsyncpa [#allocation4 + $0x1], 0 }
   0x7   :  { %20 = vsyncpa [#allocation9], 0 }
   0x8   :  { %22 = vsyncpa [#allocation9 + $0x1], 0  ;;  %s1050_s24 = smov 0   ;;  %s1052_s25 = smov 0  }
   0x9   :  { %s1054_s26 = smov 0   ;;  %s1056_s27 = smov 0  }
   0xa   :  { %s1058_s28 = smov 0   ;;  %s1060_s29 = smov 0  }
   0xb LB: > { %1314 = sst [smem:[#allocation15_spill]] %s993_s28  ;;  %s1081_s30 = sadd.s32 4294967295, %s997_s29   ;;  %s997_s29 = sphi %s1060_s29, %s28_s29   ;;  %s993_s28 = sphi %s1058_s28, %s1333_s28   ;;  %s989_s27 = sphi %s1056_s27, %s1332_s27   ;;  %s985_s26 = sphi %s1054_s26, %s1336_s26   ;;  %s981_s25 = sphi %s1052_s25, %s1335_s25   ;;  %s977_s24 = sphi %s1050_s24, %s1334_s24  }
   0xc   : > { %s1308_s8 = sadd.s32 4294967294, %s997_s29   ;;  %p62_p0 = scmp.ne.s32.totalorder %s981_s25, %s977_s24 }
   0xd   : > { %p1312_p1 = scmp.eq.s32.totalorder %s1081_s30, 0  ;;  %p178_p3 = scmp.eq.s32.totalorder %s1308_s8, 1 }
   0xe   : > { %p672_p5 = scmp.ge.s32.totalorder %s997_s29, 1  ;;  %p241_p7 = scmp.lt.s32.totalorder %s997_s29, 3 }
   0xf   : > { %p1092_p4 = por %p1312_p1, %p62_p0  ;;  %p1097_p6 = por %p178_p3, %p62_p0 }
  0x10   : > { %p1102_p8 = pnand %p672_p5, %p241_p7  ;;  %s999_s12 = smov [#allocation5]  }
  0x11   : > { %s1316_s10 = scalar_select %p1097_p6, 1, 0 }
  0x12   : > { %s259_s13 = sshll.u32 %s999_s12, 4  ;;  %p722_p9 = pneg %p1102_p8  ;;  %s260_s13 = int_to_ptr.vmem [resolvable:$true] %s259_s13 }
  0x13   : > { %1317 = sst [smem:[#allocation16_spill]] %s1316_s10  ;;  %s40_s15 = sadd.s32 1, %s993_s28 }
  0x14   : > { %p1111_p11 = pnand %p722_p9, %p1312_p1  ;;  %s814_s16 = scalar_lea.vmem %s260_s13, 256 }
  0x15   : > { %p815_p13 = scmp.ne.s32.totalorder %s260_s13, %s814_s16  ;;  %p822_p5 = scmp.lt.s32.totalorder %s260_s13, %s260_s13 }
  0x16   : > { %p805_p12 = pneg %p1111_p11  ;;  %p823_p7 = scmp.lt.s32.totalorder %s814_s16, %s814_s16 }
  0x18   : > { %p817_p0 = pnand %p815_p13, %p805_p12  ;;  %p824_p2 = por %p823_p7, %p822_p5 }
  0x1a   : > { %p818_p3 = pneg %p817_p0 }
  0x1c   : > { %p825_p6 = pnand %p824_p2, %p818_p3 }
  0x1e   : > { %828 = shalt.err (!%p825_p6)
}
  0x1f   : > { %s1000_s17 = smov 64   ;;  %s1001_s18 = smov 4  }
  0x20   : > { %s1320_s3 = sld [smem:[#allocation18_spill]]  ;;  %p42_p2 = scmp.ge.s32.totalorder %s40_s15, 2 }
  0x21   : > { %s49_s21 = sadd.s32 1, %s985_s26  ;;  %p56_p6 = scmp.ne.s32.totalorder %s985_s26, %s981_s25 }
  0x22   : > { %p57_p9 = scmp.eq.s32.totalorder %s997_s29, 0  ;;  %s1338_s15 = smov (%p42_p2, %s40_s15), 0 }
  0x23   : > { %1321 = sst [smem:[#allocation17_spill]] %s1338_s15  ;;  %p1323_p13 = scmp.eq.s32.totalorder %s1081_s30, 1 }
  0x24   : > { %p1129_p12 = por %p57_p9, %p56_p6  ;;  %s44_s12 = ssub.s32 %s993_s28, %s1338_s15 }
  0x25   : > { %p1135_p0 = por %p1323_p13, %p56_p6  ;;  %p741_p3 = scmp.lt.s32.totalorder %s997_s29, 2 }
  0x26   : > { %725 = dma.hbm_to_vmem [thread:$0]  (!%p1111_p11), %s1320_s3, 256, %s260_s13, [#allocation6], %s1000_s17, %s1000_s17, %s1001_s18  }
  0x27   : > { %p47_p11 = scmp.eq.s32.totalorder %s44_s12, 0  ;;  %s276_s13 = sand.u32 1, %s985_s26  }
  0x28   : > { %s675_s14 = sshll.u32 %s276_s13, 3  ;;  %s676_s17 = sshll.u32 %s993_s28, 7 }
  0x29   : > { %s1144_s16 = scalar_select %p47_p11, %s985_s26, %s49_s21  }
  0x2a   : > { %s286_s20 = scalar_lea.hbm %s1300_s0, %s676_s17  ;;  %s280_s8 = scalar_lea.vmem [#allocation2], %s675_s14 }
  0x2b   : > { %s288_s3 = sshll.u32 %s280_s8, 4  ;;  %p1152_p5 = pnand %p741_p3, %p1129_p12  ;;  %s289_s3 = int_to_ptr.vmem [resolvable:$true] %s288_s3 }
  0x2c   : > { %s277_s15 = scalar_lea.sflag [#allocation3], %s276_s13  ;;  %s842_s12 = scalar_lea.vmem %s289_s3, 128 }
  0x2d   : > { %p831_p7 = pneg %p1152_p5  ;;  %p843_p2 = scmp.ne.s32.totalorder %s289_s3, %s842_s12 }
  0x2e   : > { %s1002_s21 = smov [#allocation2]  }
  0x2f   : > { %p845_p6 = pnand %p843_p2, %p831_p7  ;;  %s847_s28 = sshll.u32 %s1002_s21, 4  ;;  %s848_s28 = int_to_ptr.vmem [resolvable:$false] %s847_s28 }
  0x30   : > { %s849_s17 = scalar_lea.vmem %s848_s28, 256  ;;  %p850_p13 = scmp.lt.s32.totalorder %s289_s3, %s848_s28 }
  0x31   : > { %p846_p9 = pneg %p845_p6  ;;  %p851_p11 = scmp.lt.s32.totalorder %s849_s17, %s842_s12 }
  0x33   : > { %p852_p10 = por %p851_p11, %p850_p13 }
  0x35   : > { %p853_p1 = pnand %p852_p10, %p846_p9 }
  0x37   : > { %856 = shalt.err (!%p853_p1)
}
  0x38   : > { %729 = dma.hbm_to_vmem [thread:$0]  (!%p1152_p5), %s286_s20, 128, %s289_s3, %s277_s15  }
  0x39   : > { %297 = sbr.rel (%p1102_p8) target bundleno = 724 (0x2d4), region = 40  ;;  %s1163_s8 = sand.u32 (!%p1102_p8), 1, %s981_s25  }
  0x3a   : > { %s678_s22 = sshll.u32 (!%p1102_p8), %s1163_s8, 3  ;;  %s300_s13 = scalar_lea.sflag (!%p1102_p8), [#allocation3], %s1163_s8 }
  0x3b   : > { %s303_s14 = scalar_lea.vmem (!%p1102_p8), [#allocation2], %s678_s22 }
  0x3e   : > { %960 = dma.done.wait (%p1092_p4), %s300_s13, 128  }
  0x3f   : > { %962 = vsyncadd (%p1092_p4), %s300_s13, 4294967168  ;;  %p1326_p1 = scmp.eq.s32.totalorder %s1081_s30, 0 }
  0x41   : > { %964 = dma.done.wait (%p1326_p1), [#allocation6], 256   ;;  %p1327_p10 = pmov %p1326_p1 }
  0x42   : > { %vm352_vm0 = vcmask 261120   ;;  %v349_v0 = vld [vmem:[%s303_s14] sm:$0xff]  ;;  %v799_v7 = vld [vmem:[#allocation5 + $0x8] sm:$0xff]   ;;  %v1003_v8 = vmov 0.0   ;;  %vm1004_vm1 = vmmov 0   ;;  %v800_v9 = vld [vmem:[#allocation5] sm:$0xff]  }
  0x43   : > { %966 = vsyncadd (%p1327_p10), [#allocation6], 4294967040  ;;  %v353_v1 = vsel %vm352_vm0, %v349_v0, 0.0  ;;  %702 = vmatprep.subr.bf16.mxu0 %v1003_v8  ;;  %706 = vmatprep.mubr.msk.bf16.mxu0 %vm1004_vm1, %v1003_v8  ;;  %v683_v14 = vld [vmem:[%s1301_s1] ss:$0 sm:$0xff]  ;;  %s1188_s18 = sshll.u32 %s1163_s8, 2 }
  0x44   : > { %354 = vadd.xlane.f32.xlu0 %v353_v1  ;;  %703 = vmatpush3.bf16.msra.mxu0 %v799_v7  ;;  %v684_v16 = vld [vmem:[%s1302_s2] ss:$0 sm:$0xff]  ;;  %s1191_s19 = sshll.u32 %s989_s27, 6  ;;  %s333_s20 = scalar_lea.vmem [#allocation7], %s1188_s18  ;;  %vm450_vm2 = vcmask 257024  }
  0x45   : > { %704 = vmatprep.subr.bf16.mxu0 %v1003_v8  ;;  %v685_v20 = vld [vmem:[%s1304_s4] ss:$0 sm:$0xff]  ;;  %s489_s12 = sshll.u32 %s333_s20, 4  ;;  %s1005_s21 = smov 96   ;;  %s490_s12 = int_to_ptr.vmem [resolvable:$true] %s489_s12 }
  0x46   : > { %s1198_s13 = scalar_lea.hbm %s1305_s5, %s1191_s19  ;;  %s465_s27 = scalar_lea.sflag [#allocation4], %s1163_s8 }
  0x47   : > { %s857_s14 = scalar_lea.vmem %s490_s12, 64  ;;  %s1006_s3 = smov [#allocation7]  }
  0x48   : > { %705 = vmatpush3.bf16.msra.mxu0 %v800_v9  ;;  %p858_p4 = scmp.ne.s32.totalorder %s490_s12, %s857_s14  ;;  %s861_s28 = sshll.u32 %s1006_s3, 4  ;;  %s862_s28 = int_to_ptr.vmem [resolvable:$false] %s861_s28 }
  0x49   : > { %s863_s9 = scalar_lea.vmem %s862_s28, 128  ;;  %p864_p3 = scmp.lt.s32.totalorder %s490_s12, %s862_s28 }
  0x4a   : > { %p859_p8 = pnand %p858_p4, %p1135_p0  ;;  %p865_p5 = scmp.lt.s32.totalorder %s863_s9, %s857_s14 }
  0x4c   : > { %p860_p12 = pneg %p859_p8  ;;  %p866_p7 = por %p865_p5, %p864_p3 }
  0x4e   : > { %p867_p2 = pnand %p866_p7, %p860_p12 }
  0xcd   : > { %v355_v2 = vpop.xlane.xlu0 %354 }
  0xce   : > { %v357_v3 = vmul.f32 0.03125, %v355_v2 }
  0xd0   : > { %v358_v4 = vsub.f32 %v349_v0, %v357_v3 }
  0xd2   : > { %v359_v5 = vmul.f32 %v358_v4, %v358_v4 }
  0xd4   : > { %v360_v6 = vsel %vm352_vm0, %v359_v5, 0.0 }
  0xd5   : > { %361 = vadd.xlane.f32.xlu0 %v360_v6 }
 0x15e   : > { %v362_v10 = vpop.xlane.xlu0 %361 }
 0x15f   : > { %v363_v11 = vmul.f32 0.03125, %v362_v10 }
 0x161   : > { %v364_v12 = vadd.f32 1e-05, %v363_v11 }
 0x163   : > { %801 = vrsqrt.f32 %v364_v12 }
 0x170   : > { %v802_v13 = vpop.eup %801 }
 0x171   : > { %v366_v15 = vmul.f32 %v802_v13, %v358_v4 }
 0x173   : > { %v373_v17 = vmul.f32 %v683_v14, %v366_v15 }
 0x175   : > { %v380_v18 = vadd.f32 %v684_v16, %v373_v17 }
 0x177   : > { %v381_v19 = vpack.c.bf16 %v380_v18, %v380_v18 }
 0x179   : > { %707 = vmatmul.mubr.msk.bf16.vlgmr.msra.gmra.mxu0 %vm352_vm0, %v381_v19 }
 0x239   : > { %v442_v21 = vpop.f32.mrf.mxu0 }
 0x23a   : > { %v443_v22 = vadd.f32 %v685_v20, %v442_v21 }
 0x23b   : > { %v708_v23 = vpop.f32.mrf.mxu0 }
 0x23c   : > { %v448_v24 = vmul.f32 0.35355338, %v443_v22  ;;  %v698_v25 = vpack.c.bf16 %v443_v22, %v443_v22 }
 0x23d   : > { %v445_v26 = vpop.f32.mrf.mxu0 }
 0x23e   : > { %v449_v27 = vpack.c.bf16 %v448_v24, %v448_v24  ;;  %456 = vrot.lane.b32.xlu1 %v698_v25, %s1005_s21 }
 0x23f   : > { %v709_v28 = vpop.f32.mrf.mxu0 }
 0x240   : > { %451 = vst.msk [vmem:[%s333_s20] sm:$0xf] %vm450_vm2, %v449_v27 }
 0x241   : > { %870 = shalt.err (!%p867_p2)
}
 0x242   : > { %s871_s10 = scalar_lea.hbm %s1198_s13, 64  ;;  %s875_s15 = scalar_lea.hbm %s1305_s5, 128 }
 0x243   : > { %p872_p6 = scmp.ne.s32.totalorder %s1198_s13, %s871_s10  ;;  %p876_p11 = scmp.lt.s32.totalorder %s1198_s13, %s1305_s5 }
 0x244   : > { %p877_p1 = scmp.lt.s32.totalorder %s875_s15, %s871_s10 }
 0x245   : > { %p873_p9 = pnand %p872_p6, %p1135_p0 }
 0x246   : > { %p878_p10 = por %p877_p1, %p876_p11 }
 0x247   : > { %p874_p13 = pneg %p873_p9 }
 0x249   : > { %p879_p4 = pnand %p878_p10, %p874_p13 }
 0x24b   : > { %882 = shalt.err (!%p879_p4)
}
 0x24c   : > { %716 = dma.vmem_to_hbm [thread:$0]  (%p1135_p0), %s490_s12, 64, %s1198_s13, %s465_s27  }
 0x24d   : > { %s1007_s17 = smov 64   ;;  %s469_s22 = sand.u32 1, %s1081_s30  }
 0x24e   : > { %460 = vrot.lane.b32.xlu1 %v698_v25, %s1007_s17  ;;  %s340_s14 = scalar_lea.vmem [#allocation8], %s1188_s18  ;;  %s1224_s10 = scalar_lea.hbm %s1306_s6, %s1191_s19 }
 0x24f   : > { %s503_s3 = sshll.u32 %s340_s14, 4  ;;  %s347_s8 = scalar_lea.vmem [#allocation10], %s1188_s18  ;;  %s1226_s3 = int_to_ptr.vmem [resolvable:$true] %s503_s3 }
 0x250   : > { %s517_s11 = sshll.u32 %s347_s8, 4  ;;  %s1232_s12 = scalar_lea.sflag [#allocation9], %s469_s22  ;;  %s518_s11 = int_to_ptr.vmem [resolvable:$true] %s517_s11 }
 0x251   : > { %s883_s30 = scalar_lea.vmem %s1226_s3, 64  ;;  %s1008_s13 = smov [#allocation8]  }
 0x252   : > { %p884_p8 = scmp.ne.s32.totalorder %s1226_s3, %s883_s30  ;;  %s887_s27 = sshll.u32 %s1008_s13, 4  ;;  %s888_s27 = int_to_ptr.vmem [resolvable:$false] %s887_s27 }
 0x253   : > { %s889_s15 = scalar_lea.vmem %s888_s27, 128  ;;  %p890_p5 = scmp.lt.s32.totalorder %s1226_s3, %s888_s27 }
 0x254   : > { %p885_p12 = pnand %p884_p8, %p1135_p0  ;;  %p891_p7 = scmp.lt.s32.totalorder %s889_s15, %s883_s30 }
 0x256   : > { %p886_p3 = pneg %p885_p12  ;;  %p892_p2 = por %p891_p7, %p890_p5 }
 0x258   : > { %p893_p6 = pnand %p892_p2, %p886_p3 }
 0x2b0   : > { %v457_v29 = vpop.permute.xlu1 %456 }
 0x2b1   : > { %459 = vst.msk [vmem:[%s340_s14] sm:$0xf] %vm450_vm2, %v457_v29 }
 0x2b2   : > { %896 = shalt.err (!%p893_p6)
}
 0x2b3   : > { %s897_s20 = scalar_lea.hbm %s1224_s10, 64  ;;  %s901_s22 = scalar_lea.hbm %s1306_s6, 128 }
 0x2b4   : > { %p898_p9 = scmp.ne.s32.totalorder %s1224_s10, %s897_s20  ;;  %p902_p1 = scmp.lt.s32.totalorder %s1224_s10, %s1306_s6 }
 0x2b5   : > { %p903_p10 = scmp.lt.s32.totalorder %s901_s22, %s897_s20 }
 0x2b6   : > { %p899_p13 = pnand %p898_p9, %p1135_p0 }
 0x2b7   : > { %p904_p4 = por %p903_p10, %p902_p1 }
 0x2b8   : > { %p900_p11 = pneg %p899_p13 }
 0x2ba   : > { %p905_p8 = pnand %p904_p4, %p900_p11 }
 0x2bc   : > { %908 = shalt.err (!%p905_p8)
}
 0x2bd   : > { %717 = dma.vmem_to_hbm [thread:$0]  (%p1135_p0), %s1226_s3, 64, %s1224_s10, %s1232_s12  }
 0x2be   : > { %s515_s13 = scalar_lea.hbm %s1307_s7, %s1191_s19  ;;  %s909_s27 = scalar_lea.vmem %s518_s11, 64 }
 0x2bf   : > { %p910_p12 = scmp.ne.s32.totalorder %s518_s11, %s909_s27  ;;  %s1009_s15 = smov [#allocation10]  }
 0x2c0   : > { %v461_v30 = vpop.permute.xlu1 %460  ;;  %s913_s20 = sshll.u32 %s1009_s15, 4  ;;  %s914_s20 = int_to_ptr.vmem [resolvable:$false] %s913_s20 }
 0x2c1   : > { %463 = vst.msk [vmem:[%s347_s8] sm:$0xf] %vm450_vm2, %v461_v30  ;;  %p911_p3 = pnand %p910_p12, %p1135_p0  ;;  %s915_s21 = scalar_lea.vmem %s914_s20, 128 }
 0x2c2   : > { %p916_p7 = scmp.lt.s32.totalorder %s518_s11, %s914_s20  ;;  %p917_p2 = scmp.lt.s32.totalorder %s915_s21, %s909_s27 }
 0x2c3   : > { %p912_p5 = pneg %p911_p3 }
 0x2c4   : > { %p918_p6 = por %p917_p2, %p916_p7 }
 0x2c6   : > { %p919_p9 = pnand %p918_p6, %p912_p5 }
 0x2c8   : > { %922 = shalt.err (!%p919_p9)
}
 0x2c9   : > { %s923_s19 = scalar_lea.hbm %s515_s13, 64  ;;  %s927_s10 = scalar_lea.hbm %s1307_s7, 128 }
 0x2ca   : > { %p924_p13 = scmp.ne.s32.totalorder %s515_s13, %s923_s19  ;;  %p928_p10 = scmp.lt.s32.totalorder %s515_s13, %s1307_s7 }
 0x2cb   : > { %p929_p4 = scmp.lt.s32.totalorder %s927_s10, %s923_s19 }
 0x2cc   : > { %p925_p11 = pnand %p924_p13, %p1135_p0 }
 0x2cd   : > { %p930_p8 = por %p929_p4, %p928_p10 }
 0x2ce   : > { %p926_p1 = pneg %p925_p11 }
 0x2d0   : > { %p931_p12 = pnand %p930_p8, %p926_p1 }
 0x2d2   : > { %934 = shalt.err (!%p931_p12)
}
 0x2d3   : > { %718 = dma.vmem_to_hbm [thread:$0]  (%p1135_p0), %s518_s11, 64, %s515_s13, %s1232_s12  }
 0x2d4 PF: > { %s1328_s22 = sld [smem:[#allocation16_spill]]  ;;  %s529_s14 = sand.u32 1, %s977_s24  }
 0x2d5   : > { %p1330_p5 = scmp.ge.s32.totalorder %s997_s29, 2  ;;  %s530_s28 = scalar_lea.sflag [#allocation4], %s529_s14 }
 0x2da   : > { %p1329_p3 = scmp.ne.s32.totalorder %s1328_s22, 0 }
 0x2dc   : > { %p731_p7 = pnand %p1330_p5, %p1329_p3 }
 0x2de   : > { %p732_p2 = pneg %p731_p7 }
 0x2e0   : > { %968 = dma.done.wait (%p732_p2), %s530_s28, 64  }
 0x2e1   : > { %970 = vsyncadd (%p732_p2), %s530_s28, 4294967232  ;;  %s1331_s9 = sadd.s32 4294967294, %s997_s29  }
 0x2e2   : > { %s538_s30 = sand.u32 1, %s1331_s9  }
 0x2e3   : > { %s539_s27 = scalar_lea.sflag [#allocation9], %s538_s30 }
 0x2e4   : > { %972 = dma.done.wait (%p732_p2), %s539_s27, 128  }
 0x2e5   : > { %974 = vsyncadd (%p732_p2), %s539_s27, 4294967168  ;;  %s28_s29 = sadd.s32 1, %s997_s29   ;;  %s1332_s27 = sld [smem:[#allocation15_spill]] }
 0x2e6   : > { %p25_p0 = scmp.ge.s32.totalorder %s28_s29, 4   ;;  %s1333_s28 = sld [smem:[#allocation17_spill]] }
 0x2e7   : > { %s1334_s24 = smov %s981_s25  ;;  %s1335_s25 = smov %s985_s26 }
 0x2e8   : > { %s1336_s26 = smov %s1144_s16  ;;  %27 = sbr.rel (!%p25_p0) target bundleno = 11 (0xb), region = 121 }
 0x2ed   :  { %553 = vsyncpa [#allocation3], 1 }
 0x2ee   :  { %555 = vsyncpa [#allocation3 + $0x1], 1 }
 0x2ef   :  { %556 = vsyncpa [#allocation6], 1 }
 0x2f0   :  { %557 = vsyncpa [#allocation4], 1 }
 0x2f1   :  { %559 = vsyncpa [#allocation4 + $0x1], 1 }
 0x2f2   :  { %560 = vsyncpa [#allocation9], 1 }
 0x2f3   :  { %562 = vsyncpa [#allocation9 + $0x1], 1 }

</bundles_post_ra>
